<compile_context>
chip_gen: v5e
topology: v5e:2x2
jax: 0.10.0
libtpu: 0.0.40
codegen_flags: <defaults>
</compile_context>

<pallas_src>
import functools

import jax
import jax.numpy as jnp
from jax.experimental import pallas as pl
from jax.experimental.pallas import tpu as pltpu


def hetero_mpn_kernel(*refs, n_task, num_layers):
    """Full multi-layer heterogeneous GraphConv MPN in one kernel invocation.

    refs = (a_src_task, a_dt, x_task, x_dev,
            per layer: W_task_cat, b_task [, W_dev_cat, b_dev],
            out)
    """
    a_src_task_ref, a_dt_ref, x_task_ref, x_dev_ref = refs[:4]
    o_ref = refs[-1]
    params = refs[4:-1]

    cdt = jnp.bfloat16                      # MXU operand dtype (accumulate in f32)
    a_src_task = a_src_task_ref[...]        # (N_t + N_d, N_t)  = [A_tt ; A_td]
    a_dt = a_dt_ref[...]                    # (N_t, N_d)
    h_t = x_task_ref[...]                   # (N_t, C) bf16
    h_d = x_dev_ref[...]                    # (N_d, C) bf16

    idx = 0
    for layer in range(num_layers):
        last = layer == num_layers - 1

        # --- aggregation (sum over incoming edges) --------------------------
        # Both 'task'-sourced adjacencies are pre-stacked host-side -> one MXU
        # pass sharing the pushed RHS h_t; slice the two destination halves
        # (sublane-axis slices at 8-aligned offsets).
        s = jnp.dot(a_src_task, h_t, preferred_element_type=jnp.float32)
        agg_tt = s[:n_task, :]              # messages into dst='task'
        agg_td = s[n_task:, :]              # messages into dst='dev'
        agg_dt = jnp.dot(a_dt, h_d, preferred_element_type=jnp.float32)

        # --- fused per-destination linear + hetero 'sum' ---------------------
        # lin_rel of every edge type into this destination and the (summed)
        # lin_root are one host-stacked weight => one K-concatenated matmul
        # plus a single bias add.
        w_t = params[idx][...]
        b_t = params[idx + 1][...]
        idx += 2
        zt_in = jnp.concatenate(
            [agg_tt, agg_dt, h_t.astype(jnp.float32)], axis=-1).astype(cdt)
        z_t = jnp.dot(zt_in, w_t, preferred_element_type=jnp.float32) + b_t

        if last:
            # forward() only returns out_dict['task']; the unused 'dev' head of
            # the final layer is dead code and skipped.
            o_ref[...] = z_t.astype(o_ref.dtype)
        else:
            w_d = params[idx][...]
            b_d = params[idx + 1][...]
            idx += 2
            zd_in = jnp.concatenate(
                [agg_td, h_d.astype(jnp.float32)], axis=-1).astype(cdt)
            z_d = jnp.dot(zd_in, w_d, preferred_element_type=jnp.float32) + b_d
            # inter-layer ReLU in f32, then back to bf16 for the next MXU pass.
            h_t = jnp.maximum(z_t, 0.0).astype(cdt)
            h_d = jnp.maximum(z_d, 0.0).astype(cdt)


def gnn_hetero_forward(a_src_task, a_dt, x_task, x_dev, fused_params):
    """a_src_task: (N_t+N_d, N_t) bf16 stacked [A_task->task ; A_task->dev],
    a_dt: (N_t, N_d) bf16, x_task: (N_t, C) bf16, x_dev: (N_d, C) bf16,
    fused_params: per layer (W_task_cat, b_task[, W_dev_cat, b_dev]).
    Returns out_dict['task'] of shape (N_t, C_out) f32."""
    n_task = x_task.shape[0]
    num_layers = len(fused_params)
    out_dim = fused_params[-1][0].shape[1]

    flat_params = [p for layer in fused_params for p in layer]
    inputs = [a_src_task, a_dt, x_task, x_dev] + flat_params

    # Everything fits comfortably in VMEM at this size -> full-array blocks, no grid.
    full = lambda arr: pl.BlockSpec(arr.shape, lambda: (0,) * arr.ndim)

    kernel = functools.partial(hetero_mpn_kernel, n_task=n_task,
                               num_layers=num_layers)
    return pl.pallas_call(
        kernel,
        out_shape=jax.ShapeDtypeStruct((n_task, out_dim), jnp.float32),
        in_specs=[full(a) for a in inputs],
        out_specs=pl.BlockSpec((n_task, out_dim), lambda: (0, 0)),
        compiler_params=pltpu.CompilerParams(),
    )(*inputs)


# ---------------------------------------------------------------------------
# Host-side glue: dense adjacencies, parameter init, to_hetero weight fusion.
# ---------------------------------------------------------------------------
def dense_adj(edge_index, n_dst, n_src):
    """edge_index = (src, dst); A[d, s] = #edges s->d (GraphConv 'add' aggregation)."""
    src, dst = edge_index
    return jnp.zeros((n_dst, n_src), jnp.float32).at[dst, src].add(1.0)


def init_linear(key, in_dim, out_dim, bias=True):
    kw, kb = jax.random.split(key)
    bound = 1.0 / float(in_dim) ** 0.5
    w = jax.random.uniform(kw, (out_dim, in_dim), jnp.float32, -bound, bound)
    b = (jax.random.uniform(kb, (out_dim,), jnp.float32, -bound, bound)
         if bias else None)
    return w, b


def init_graph_conv(key, in_src, in_dst, out_dim):
    """PyG GraphConv: lin_rel (with bias) on aggregated src feats, lin_root (no bias) on dst feats."""
    k_rel, k_root = jax.random.split(key)
    w_rel, b_rel = init_linear(k_rel, in_src, out_dim, bias=True)
    w_root, _ = init_linear(k_root, in_dst, out_dim, bias=False)
    return {"w_rel": w_rel, "b_rel": b_rel, "w_root": w_root}


def fuse_layer_params(layer, last):
    """Fold the hetero 'sum' over edge types + lin_rel/lin_root into one weight per dst."""
    dt = jnp.bfloat16
    # dst='task': edge types ('task','depends','task') and ('dev','feeds','task').
    # K-block order must match the kernel concat: [agg_tt, agg_dt, h_task].
    w_task = jnp.concatenate(
        [layer["tt"]["w_rel"].T,
         layer["dt"]["w_rel"].T,
         (layer["tt"]["w_root"] + layer["dt"]["w_root"]).T], axis=0).astype(dt)
    b_task = (layer["tt"]["b_rel"] + layer["dt"]["b_rel"]).reshape(1, -1)
    if last:
        return (w_task, b_task)
    # dst='dev': edge type ('task','runs_on','dev'); K-block order [agg_td, h_dev].
    w_dev = jnp.concatenate(
        [layer["td"]["w_rel"].T, layer["td"]["w_root"].T], axis=0).astype(dt)
    b_dev = layer["td"]["b_rel"].reshape(1, -1)
    return (w_task, b_task, w_dev, b_dev)


def reference_forward(x_t, x_d, a_tt, a_dt, a_td, params):
    """Pure-JAX f32 reference using the unfused per-edge-type GraphConv weights."""
    h_t, h_d = x_t, x_d
    num_layers = len(params)
    for l, p in enumerate(params):
        z_t = ((a_tt @ h_t) @ p["tt"]["w_rel"].T + p["tt"]["b_rel"]
               + h_t @ p["tt"]["w_root"].T
               + (a_dt @ h_d) @ p["dt"]["w_rel"].T + p["dt"]["b_rel"]
               + h_t @ p["dt"]["w_root"].T)
        if l == num_layers - 1:
            return z_t
        z_d = ((a_td @ h_t) @ p["td"]["w_rel"].T + p["td"]["b_rel"]
               + h_d @ p["td"]["w_root"].T)
        h_t, h_d = jax.nn.relu(z_t), jax.nn.relu(z_d)


if __name__ == "__main__":
    key = jax.random.PRNGKey(0)
    keys = jax.random.split(key, 14)

    N_TASK, N_DEV = 40, 16          # nodes per node type
    F_IN = 16                       # raw input feature dim (lazy GraphConv(-1, ...))
    HIDDEN = 40                     # hidden_channels
    OUT = 2                         # num_output_features in GNNHetero
    NUM_LAYERS = 3                  # num_mpn_layers

    x_task = jax.random.normal(keys[0], (N_TASK, F_IN), jnp.float32)
    x_dev = jax.random.normal(keys[1], (N_DEV, F_IN), jnp.float32)

    def rand_edges(k, n_src, n_dst, n_e):
        ks, kd = jax.random.split(k)
        return (jax.random.randint(ks, (n_e,), 0, n_src),
                jax.random.randint(kd, (n_e,), 0, n_dst))

    e_tt = rand_edges(keys[2], N_TASK, N_TASK, 120)   # ('task','depends','task')
    e_dt = rand_edges(keys[3], N_DEV, N_TASK, 64)     # ('dev','feeds','task')
    e_td = rand_edges(keys[4], N_TASK, N_DEV, 64)     # ('task','runs_on','dev')

    a_tt = dense_adj(e_tt, N_TASK, N_TASK)
    a_dt = dense_adj(e_dt, N_TASK, N_DEV)
    a_td = dense_adj(e_td, N_DEV, N_TASK)

    # Per-layer, per-edge-type GraphConv params (independent clones, as to_hetero does).
    layer_dims = ([(F_IN, F_IN, HIDDEN)]
                  + [(HIDDEN, HIDDEN, HIDDEN)] * (NUM_LAYERS - 2)
                  + [(HIDDEN, HIDDEN, OUT)])
    params = []
    k = 5
    for (c_t, c_d, c_out) in layer_dims:
        params.append({
            "tt": init_graph_conv(keys[k + 0], c_t, c_t, c_out),
            "dt": init_graph_conv(keys[k + 1], c_d, c_t, c_out),
            "td": init_graph_conv(keys[k + 2], c_t, c_d, c_out),
        })
        k += 3

    # Host-side fusion + bf16 casts (perf feedback: fold scalars/biases, stack
    # adjacencies & weights, bf16 MXU operands).
    fused = [fuse_layer_params(params[l], l == NUM_LAYERS - 1)
             for l in range(NUM_LAYERS)]
    a_src_task = jnp.concatenate([a_tt, a_td], axis=0).astype(jnp.bfloat16)
    a_dt_b = a_dt.astype(jnp.bfloat16)
    x_task_b = x_task.astype(jnp.bfloat16)
    x_dev_b = x_dev.astype(jnp.bfloat16)

    out = gnn_hetero_forward(a_src_task, a_dt_b, x_task_b, x_dev_b, fused)
    out = jax.block_until_ready(out)

    # Pure-JAX f32 reference (loose tolerance: kernel uses bf16 MXU operands).
    ref = reference_forward(x_task, x_dev, a_tt, a_dt, a_td, params)
    assert out.shape == (N_TASK, OUT)
    assert jnp.allclose(out, ref, rtol=5e-2, atol=5e-2), \
        float(jnp.max(jnp.abs(out - ref)))

    print("KERNEL_OK")
</pallas_src>

<mosaic_0001>
module attributes {stable_mosaic.version = 11 : i64} {
  func.func @hetero_mpn_kernel(%arg0: memref<56x40xbf16, #tpu.memory_space<vmem>>, %arg1: memref<40x16xbf16, #tpu.memory_space<vmem>>, %arg2: memref<40x16xbf16, #tpu.memory_space<vmem>>, %arg3: memref<16x16xbf16, #tpu.memory_space<vmem>>, %arg4: memref<48x40xbf16, #tpu.memory_space<vmem>>, %arg5: memref<1x40xf32, #tpu.memory_space<vmem>>, %arg6: memref<32x40xbf16, #tpu.memory_space<vmem>>, %arg7: memref<1x40xf32, #tpu.memory_space<vmem>>, %arg8: memref<120x40xbf16, #tpu.memory_space<vmem>>, %arg9: memref<1x40xf32, #tpu.memory_space<vmem>>, %arg10: memref<80x40xbf16, #tpu.memory_space<vmem>>, %arg11: memref<1x40xf32, #tpu.memory_space<vmem>>, %arg12: memref<120x2xbf16, #tpu.memory_space<vmem>>, %arg13: memref<1x2xf32, #tpu.memory_space<vmem>>, %arg14: memref<40x2xf32, #tpu.memory_space<vmem>>) attributes {dimension_semantics = [], scalar_prefetch = 0 : i64, scratch_operands = 0 : i64, tpu.core_type = #tpu.core_type<tc>} {
    %c0 = arith.constant 0 : index
    %c0_0 = arith.constant 0 : index
    %0 = vector.load %arg0[%c0, %c0_0] : memref<56x40xbf16, #tpu.memory_space<vmem>>, vector<56x40xbf16>
    %c0_1 = arith.constant 0 : index
    %c0_2 = arith.constant 0 : index
    %1 = vector.load %arg1[%c0_1, %c0_2] : memref<40x16xbf16, #tpu.memory_space<vmem>>, vector<40x16xbf16>
    %c0_3 = arith.constant 0 : index
    %c0_4 = arith.constant 0 : index
    %2 = vector.load %arg2[%c0_3, %c0_4] : memref<40x16xbf16, #tpu.memory_space<vmem>>, vector<40x16xbf16>
    %c0_5 = arith.constant 0 : index
    %c0_6 = arith.constant 0 : index
    %3 = vector.load %arg3[%c0_5, %c0_6] : memref<16x16xbf16, #tpu.memory_space<vmem>>, vector<16x16xbf16>
    %cst = arith.constant dense<0.000000e+00> : vector<56x16xf32>
    %4 = tpu.matmul %0, %2, %cst {dimension_numbers = #tpu.dot_dimension_numbers<[1], [0], [0], [1], [0, 0, 1, 1], [], []>} : vector<56x40xbf16>, vector<40x16xbf16>, vector<56x16xf32> -> vector<56x16xf32>
    %5 = vector.extract_strided_slice %4 {offsets = [0, 0], sizes = [40, 16], strides = [1, 1]} : vector<56x16xf32> to vector<40x16xf32>
    %6 = vector.extract_strided_slice %4 {offsets = [40, 0], sizes = [16, 16], strides = [1, 1]} : vector<56x16xf32> to vector<16x16xf32>
    %cst_7 = arith.constant dense<0.000000e+00> : vector<40x16xf32>
    %7 = tpu.matmul %1, %3, %cst_7 {dimension_numbers = #tpu.dot_dimension_numbers<[1], [0], [0], [1], [0, 0, 1, 1], [], []>} : vector<40x16xbf16>, vector<16x16xbf16>, vector<40x16xf32> -> vector<40x16xf32>
    %c0_8 = arith.constant 0 : index
    %c0_9 = arith.constant 0 : index
    %8 = vector.load %arg4[%c0_8, %c0_9] : memref<48x40xbf16, #tpu.memory_space<vmem>>, vector<48x40xbf16>
    %c0_10 = arith.constant 0 : index
    %c0_11 = arith.constant 0 : index
    %9 = vector.load %arg5[%c0_10, %c0_11] : memref<1x40xf32, #tpu.memory_space<vmem>>, vector<1x40xf32>
    %10 = arith.extf %2 : vector<40x16xbf16> to vector<40x16xf32>
    %11 = tpu.concatenate %5, %7, %10 in 1 : vector<40x16xf32>, vector<40x16xf32>, vector<40x16xf32> -> vector<40x48xf32>
    %12 = arith.truncf %11 : vector<40x48xf32> to vector<40x48xbf16>
    %cst_12 = arith.constant dense<0.000000e+00> : vector<40x40xf32>
    %13 = tpu.matmul %12, %8, %cst_12 {dimension_numbers = #tpu.dot_dimension_numbers<[1], [0], [0], [1], [0, 0, 1, 1], [], []>} : vector<40x48xbf16>, vector<48x40xbf16>, vector<40x40xf32> -> vector<40x40xf32>
    %14 = vector.broadcast %9 : vector<1x40xf32> to vector<40x40xf32>
    %15 = arith.addf %13, %14 : vector<40x40xf32>
    %c0_13 = arith.constant 0 : index
    %c0_14 = arith.constant 0 : index
    %16 = vector.load %arg6[%c0_13, %c0_14] : memref<32x40xbf16, #tpu.memory_space<vmem>>, vector<32x40xbf16>
    %c0_15 = arith.constant 0 : index
    %c0_16 = arith.constant 0 : index
    %17 = vector.load %arg7[%c0_15, %c0_16] : memref<1x40xf32, #tpu.memory_space<vmem>>, vector<1x40xf32>
    %18 = arith.extf %3 : vector<16x16xbf16> to vector<16x16xf32>
    %19 = tpu.concatenate %6, %18 in 1 : vector<16x16xf32>, vector<16x16xf32> -> vector<16x32xf32>
    %20 = arith.truncf %19 : vector<16x32xf32> to vector<16x32xbf16>
    %cst_17 = arith.constant dense<0.000000e+00> : vector<16x40xf32>
    %21 = tpu.matmul %20, %16, %cst_17 {dimension_numbers = #tpu.dot_dimension_numbers<[1], [0], [0], [1], [0, 0, 1, 1], [], []>} : vector<16x32xbf16>, vector<32x40xbf16>, vector<16x40xf32> -> vector<16x40xf32>
    %22 = vector.broadcast %17 : vector<1x40xf32> to vector<16x40xf32>
    %23 = arith.addf %21, %22 : vector<16x40xf32>
    %cst_18 = arith.constant 0.000000e+00 : f32
    %24 = vector.broadcast %cst_18 : f32 to vector<40x40xf32>
    %25 = arith.maximumf %15, %24 : vector<40x40xf32>
    %26 = arith.truncf %25 : vector<40x40xf32> to vector<40x40xbf16>
    %cst_19 = arith.constant 0.000000e+00 : f32
    %27 = vector.broadcast %cst_19 : f32 to vector<16x40xf32>
    %28 = arith.maximumf %23, %27 : vector<16x40xf32>
    %29 = arith.truncf %28 : vector<16x40xf32> to vector<16x40xbf16>
    %cst_20 = arith.constant dense<0.000000e+00> : vector<56x40xf32>
    %30 = tpu.matmul %0, %26, %cst_20 {dimension_numbers = #tpu.dot_dimension_numbers<[1], [0], [0], [1], [0, 0, 1, 1], [], []>} : vector<56x40xbf16>, vector<40x40xbf16>, vector<56x40xf32> -> vector<56x40xf32>
    %31 = vector.extract_strided_slice %30 {offsets = [0, 0], sizes = [40, 40], strides = [1, 1]} : vector<56x40xf32> to vector<40x40xf32>
    %32 = vector.extract_strided_slice %30 {offsets = [40, 0], sizes = [16, 40], strides = [1, 1]} : vector<56x40xf32> to vector<16x40xf32>
    %cst_21 = arith.constant dense<0.000000e+00> : vector<40x40xf32>
    %33 = tpu.matmul %1, %29, %cst_21 {dimension_numbers = #tpu.dot_dimension_numbers<[1], [0], [0], [1], [0, 0, 1, 1], [], []>} : vector<40x16xbf16>, vector<16x40xbf16>, vector<40x40xf32> -> vector<40x40xf32>
    %c0_22 = arith.constant 0 : index
    %c0_23 = arith.constant 0 : index
    %34 = vector.load %arg8[%c0_22, %c0_23] : memref<120x40xbf16, #tpu.memory_space<vmem>>, vector<120x40xbf16>
    %c0_24 = arith.constant 0 : index
    %c0_25 = arith.constant 0 : index
    %35 = vector.load %arg9[%c0_24, %c0_25] : memref<1x40xf32, #tpu.memory_space<vmem>>, vector<1x40xf32>
    %36 = arith.extf %26 : vector<40x40xbf16> to vector<40x40xf32>
    %37 = tpu.concatenate %31, %33, %36 in 1 : vector<40x40xf32>, vector<40x40xf32>, vector<40x40xf32> -> vector<40x120xf32>
    %38 = arith.truncf %37 : vector<40x120xf32> to vector<40x120xbf16>
    %cst_26 = arith.constant dense<0.000000e+00> : vector<40x40xf32>
    %39 = tpu.matmul %38, %34, %cst_26 {dimension_numbers = #tpu.dot_dimension_numbers<[1], [0], [0], [1], [0, 0, 1, 1], [], []>} : vector<40x120xbf16>, vector<120x40xbf16>, vector<40x40xf32> -> vector<40x40xf32>
    %40 = vector.broadcast %35 : vector<1x40xf32> to vector<40x40xf32>
    %41 = arith.addf %39, %40 : vector<40x40xf32>
    %c0_27 = arith.constant 0 : index
    %c0_28 = arith.constant 0 : index
    %42 = vector.load %arg10[%c0_27, %c0_28] : memref<80x40xbf16, #tpu.memory_space<vmem>>, vector<80x40xbf16>
    %c0_29 = arith.constant 0 : index
    %c0_30 = arith.constant 0 : index
    %43 = vector.load %arg11[%c0_29, %c0_30] : memref<1x40xf32, #tpu.memory_space<vmem>>, vector<1x40xf32>
    %44 = arith.extf %29 : vector<16x40xbf16> to vector<16x40xf32>
    %45 = tpu.concatenate %32, %44 in 1 : vector<16x40xf32>, vector<16x40xf32> -> vector<16x80xf32>
    %46 = arith.truncf %45 : vector<16x80xf32> to vector<16x80xbf16>
    %cst_31 = arith.constant dense<0.000000e+00> : vector<16x40xf32>
    %47 = tpu.matmul %46, %42, %cst_31 {dimension_numbers = #tpu.dot_dimension_numbers<[1], [0], [0], [1], [0, 0, 1, 1], [], []>} : vector<16x80xbf16>, vector<80x40xbf16>, vector<16x40xf32> -> vector<16x40xf32>
    %48 = vector.broadcast %43 : vector<1x40xf32> to vector<16x40xf32>
    %49 = arith.addf %47, %48 : vector<16x40xf32>
    %cst_32 = arith.constant 0.000000e+00 : f32
    %50 = vector.broadcast %cst_32 : f32 to vector<40x40xf32>
    %51 = arith.maximumf %41, %50 : vector<40x40xf32>
    %52 = arith.truncf %51 : vector<40x40xf32> to vector<40x40xbf16>
    %cst_33 = arith.constant 0.000000e+00 : f32
    %53 = vector.broadcast %cst_33 : f32 to vector<16x40xf32>
    %54 = arith.maximumf %49, %53 : vector<16x40xf32>
    %55 = arith.truncf %54 : vector<16x40xf32> to vector<16x40xbf16>
    %cst_34 = arith.constant dense<0.000000e+00> : vector<56x40xf32>
    %56 = tpu.matmul %0, %52, %cst_34 {dimension_numbers = #tpu.dot_dimension_numbers<[1], [0], [0], [1], [0, 0, 1, 1], [], []>} : vector<56x40xbf16>, vector<40x40xbf16>, vector<56x40xf32> -> vector<56x40xf32>
    %57 = vector.extract_strided_slice %56 {offsets = [0, 0], sizes = [40, 40], strides = [1, 1]} : vector<56x40xf32> to vector<40x40xf32>
    %cst_35 = arith.constant dense<0.000000e+00> : vector<40x40xf32>
    %58 = tpu.matmul %1, %55, %cst_35 {dimension_numbers = #tpu.dot_dimension_numbers<[1], [0], [0], [1], [0, 0, 1, 1], [], []>} : vector<40x16xbf16>, vector<16x40xbf16>, vector<40x40xf32> -> vector<40x40xf32>
    %c0_36 = arith.constant 0 : index
    %c0_37 = arith.constant 0 : index
    %59 = vector.load %arg12[%c0_36, %c0_37] : memref<120x2xbf16, #tpu.memory_space<vmem>>, vector<120x2xbf16>
    %c0_38 = arith.constant 0 : index
    %c0_39 = arith.constant 0 : index
    %60 = vector.load %arg13[%c0_38, %c0_39] : memref<1x2xf32, #tpu.memory_space<vmem>>, vector<1x2xf32>
    %61 = arith.extf %52 : vector<40x40xbf16> to vector<40x40xf32>
    %62 = tpu.concatenate %57, %58, %61 in 1 : vector<40x40xf32>, vector<40x40xf32>, vector<40x40xf32> -> vector<40x120xf32>
    %63 = arith.truncf %62 : vector<40x120xf32> to vector<40x120xbf16>
    %cst_40 = arith.constant dense<0.000000e+00> : vector<40x2xf32>
    %64 = tpu.matmul %63, %59, %cst_40 {dimension_numbers = #tpu.dot_dimension_numbers<[1], [0], [0], [1], [0, 0, 1, 1], [], []>} : vector<40x120xbf16>, vector<120x2xbf16>, vector<40x2xf32> -> vector<40x2xf32>
    %65 = vector.broadcast %60 : vector<1x2xf32> to vector<40x2xf32>
    %66 = arith.addf %64, %65 : vector<40x2xf32>
    %c0_41 = arith.constant 0 : index
    %c0_42 = arith.constant 0 : index
    %67 = vector.load %arg14[%c0_41, %c0_42] : memref<40x2xf32, #tpu.memory_space<vmem>>, vector<40x2xf32>
    tpu.vector_store %arg14[%c0_41, %c0_42], %66 {strides = array<i32>} : memref<40x2xf32, #tpu.memory_space<vmem>>, vector<40x2xf32>,
    return
  }
}

</mosaic_0001>

<bundles_post_ra>
// kernel: tpu_custom_call.1
= control target key start
LH: loop header
LB: loop body
LE: loop exit
PB: predicated region body
PF: predicated region fallthrough
CT: control target
= control target key end

     0   :  { %vm164_vm0 = vcmask 130048   ;;  %vm113_vm1 = vcmask 1043456   ;;  %vm100_vm2 = vcmask 326656   ;;  %s1207_s20 = smov 16   ;;  %s1208_s22 = smov 32   ;;  %vm254_vm3 = vcmask 261120   ;;  %s1568_s3 = inlined_call_operand.vmem [shape: bf16[16,16], index: 3, kind: input, shape index: {}]   ;;  %s1569_s1 = inlined_call_operand.vmem [shape: bf16[40,16], index: 1, kind: input, shape index: {}]   ;;  %s1570_s2 = inlined_call_operand.vmem [shape: bf16[40,16], index: 2, kind: input, shape index: {}]   ;;  %s1571_s0 = inlined_call_operand.vmem [shape: bf16[56,40], index: 0, kind: input, shape index: {}]   ;;  %s1572_s5 = inlined_call_operand.vmem [shape: f32[1,40], index: 5, kind: input, shape index: {}]   ;;  %s1573_s4 = inlined_call_operand.vmem [shape: bf16[48,40], index: 4, kind: input, shape index: {}]   ;;  %s1574_s6 = inlined_call_operand.vmem [shape: bf16[32,40], index: 6, kind: input, shape index: {}]   ;;  %s1575_s7 = inlined_call_operand.vmem [shape: f32[1,40], index: 7, kind: input, shape index: {}]   ;;  %s1576_s10 = inlined_call_operand.vmem [shape: bf16[80,40], index: 10, kind: input, shape index: {}]   ;;  %s1577_s8 = inlined_call_operand.vmem [shape: bf16[120,40], index: 8, kind: input, shape index: {}]   ;;  %s1578_s11 = inlined_call_operand.vmem [shape: f32[1,40], index: 11, kind: input, shape index: {}]   ;;  %s1579_s9 = inlined_call_operand.vmem [shape: f32[1,40], index: 9, kind: input, shape index: {}]   ;;  %s1580_s13 = inlined_call_operand.vmem [shape: f32[1,2], index: 13, kind: input, shape index: {}]   ;;  %s1581_s12 = inlined_call_operand.vmem [shape: bf16[120,2], index: 12, kind: input, shape index: {}]   ;;  %s1582_s14 = inlined_call_operand.vmem [shape: f32[40,2], index: 14, kind: output, shape index: {}]  }
   0x1   :  { %v1103_v0 = vld [vmem:[%s1568_s3] sm:$0xff]  ;;  %v64_v2 = vld [vmem:[%s1570_s2 + $0x10] sm:$0xf]  ;;  %v1102_v6 = vld [vmem:[%s1570_s2 + $0x8] sm:$0xff]  ;;  %vm284_vm4 = vcmask 392192   ;;  %vm522_vm5 = vcmask 654336  }
   0x2   :  { %v1292_v1 = vld [vmem:[%s1569_s1] sm:$0xff]  ;;  %181 = vmatpush.bf16.msra.mxu1 %v1103_v0  ;;  %v94_v3 = vunpack.c.l.b16 %v64_v2  ;;  %v1309_v8 = vld [vmem:[%s1569_s1 + $0x8] sm:$0xff]  ;;  %v59_v10 = vld [vmem:[%s1569_s1 + $0x10] sm:$0xf]  ;;  %v208_v37 = vunpack.c.l.bf16 %v64_v2  ;;  %s1209_s1 = smov 80   ;;  %vm579_vm6 = vcmask 982016  }
   0x3   :  { %v1101_v7 = vld [vmem:[%s1570_s2] sm:$0xff]  ;;  %v154_v11 = vunpack.c.l.b16 %v59_v10  ;;  %v1330_v13 = vld [vmem:[%s1571_s0 + $0x8] sm:$0xff]  ;;  %v1337_v14 = vld [vmem:[%s1571_s0 + $0x10] sm:$0xff]  ;;  %vm926_vm7 = vcmask 15360  }
   0x4   :  { %v97_v4 = vpack.c.b16 %v94_v3, %v94_v3  ;;  %v1314_v9 = vld [vmem:[%s1571_s0] sm:$0xff]  ;;  %v54_v16 = vld [vmem:[%s1571_s0 + $0x18] sm:$0xf]  ;;  %v62_v31 = vld [vmem:[%s1570_s2 + $0x8] sm:$0xff]  }
   0x5   :  { %972 = vmatmul.msk.bf16.vlgmr.msra.gmra.mxu1 %vm164_vm0, %v1292_v1  ;;  %v1323_v12 = vpack.c.b16 %v154_v11, %v154_v11  ;;  %v80_v17 = vunpack.c.l.b16 %v54_v16  ;;  %v60_v20 = vld [vmem:[%s1570_s2] sm:$0xff]   ;;  %v206_v33 = vunpack.c.l.bf16 %v62_v31  ;;  %v207_v34 = vunpack.c.h.bf16 %v62_v31  ;;  %v1106_v41 = vld [vmem:[%s1573_s4 + $0x10] sm:$0xff]  ;;  %v1105_v42 = vld [vmem:[%s1573_s4 + $0x8] sm:$0xff] }
   0x6   :  { %v115_v5 = vsel %vm113_vm1, %v97_v4, 0  ;;  %v204_v22 = vunpack.c.l.bf16 %v60_v20  ;;  %v205_v23 = vunpack.c.h.bf16 %v60_v20  ;;  %v65_v26 = vld [vmem:[%s1568_s3] sm:$0xff]   ;;  %299 = vmatpush.bf16.msra.mxu2 %v1106_v41  ;;  %v1108_v60 = vld [vmem:[%s1574_s6 + $0x8] sm:$0xff] }
   0x7   :  { %122 = vmatpush.bf16.msra.mxu0 %v115_v5  ;;  %v1344_v18 = vpack.c.b16 %v80_v17, %v80_v17  ;;  %v322_v27 = vunpack.c.l.bf16 %v65_v26  ;;  %v323_v28 = vunpack.c.h.bf16 %v65_v26  ;;  %v1147_v35 = vpack.i.bf16 %v207_v34, %v206_v33  ;;  %v1104_v44 = vld [vmem:[%s1573_s4] sm:$0xff] }
   0x8   :  { %v1137_v24 = vpack.i.bf16 %v205_v23, %v204_v22  ;;  %v1107_v62 = vld [vmem:[%s1574_s6] sm:$0xff] }
   0x9   :  { %v1152_v29 = vpack.i.bf16 %v323_v28, %v322_v27  ;;  %v1202_v28 = vld [vmem:[%s1572_s5] ss:$0 sm:$0xff] }
   0xa   :  { %300 = vmatpush.bf16.msra.mxu2 %v1105_v42 }
   0xb   :  { %123 = vmatpush.bf16.msra.mxu0 %v1102_v6 }
   0xe   :  { %301 = vmatpush.bf16.msra.mxu2 %v1104_v44 }
   0xf   :  { %124 = vmatpush.bf16.msra.mxu0 %v1101_v7 }
  0x12   :  { %956 = vmatmul.msk.bf16.vlgmr.msra.gmra.mxu0 %vm100_vm2, %v1314_v9  ;;  %359 = vmatpush.bf16.msrb.mxu2 %v1108_v60 }
  0x15   :  { %973 = vmatmul.msk.bf16.gmra.mxu1 %vm164_vm0, %v1309_v8 }
  0x16   :  { %360 = vmatpush.bf16.msrb.mxu2 %v1107_v62 }
  0x22   :  { %957 = vmatmul.msk.bf16.gmra.mxu0 %vm100_vm2, %v1330_v13 }
  0x25   :  { %974 = vmatmul.msk.bf16.gmra.mxu1 %vm164_vm0, %v1323_v12 }
  0x32   :  { %958 = vmatmul.msk.bf16.gmra.mxu0 %vm100_vm2, %v1337_v14 }
  0x42   :  { %959 = vmatmul.msk.bf16.gmra.mxu0 %vm100_vm2, %v1344_v18 }
  0x82   :  { %v183_v15 = vpop.f32.mrf.mxu1 }
  0x8a   :  { %v185_v19 = vpop.f32.mrf.mxu1 }
  0x8b   :  { %v1132_v21 = vpack.i.bf16 %v185_v19, %v183_v15 }
  0x8d   :  { %1133 = vrot.lane.b32.xlu0 %v1132_v21, %s1207_s20 }
  0x8f   :  { %v126_v39 = vpop.f32.mrf.mxu0 }
  0x92   :  { %v188_v25 = vpop.f32.mrf.mxu1 }
  0x95   :  { %1138 = vrot.lane.b32.xlu0 %v1137_v24, %s1208_s22 }
  0x97   :  { %v128_v40 = vpop.f32.mrf.mxu0 }
  0x9a   :  { %v190_v30 = vpop.f32.mrf.mxu1 }
  0x9b   :  { %v1142_v32 = vpack.i.bf16 %v190_v30, %v188_v25 }
  0x9d   :  { %1143 = vrot.lane.b32.xlu1 %v1142_v32, %s1207_s20  ;;  %1153 = vrot.lane.b32.xlu0 %v1152_v29, %s1207_s20 }
  0x9f   :  { %v131_v43 = vpop.f32.mrf.mxu0 }
  0xa2   :  { %v193_v36 = vpop.f32.mrf.mxu1 }
  0xa3   :  { %222 = vrot.lane.b32.xlu2 %v193_v36, %s1207_s20 }
  0xa5   :  { %1148 = vrot.lane.b32.xlu1 %v1147_v35, %s1208_s22 }
  0xa7   :  { %v133_v45 = vpop.f32.mrf.mxu0 }
  0xaa   :  { %v195_v38 = vpop.f32.mrf.mxu1 }
  0xab   :  { %242 = vrot.lane.b32.xlu2 %v208_v37, %s1208_s22 }
  0xaf   :  { %v136_v46 = vpop.f32.mrf.mxu0 }
  0xb7   :  { %v138_v48 = vpop.f32.mrf.mxu0 }
  0xbf   :  { %v141_v54 = vpop.f32.mrf.mxu0 }
  0xc7   :  { %v143_v63 = vpop.f32.mrf.mxu0 }
  0xfd   :  { %v223_v15 = vpop.permute.xlu2 %222 }
  0xfe   :  { %v253_v17 = vsel %vm164_vm0, %v136_v46, %v223_v15 }
  0xff   :  { %v1134_v47 = vpop.permute.xlu0 %1133 }
 0x100   :  { %v1136_v49 = vunpack.i.h.bf16 %v1134_v47  ;;  %v1135_v50 = vunpack.i.l.bf16 %v1134_v47 }
 0x102   :  { %v249_v55 = vsel %vm164_vm0, %v126_v39, %v1135_v50  ;;  %v250_v56 = vsel %vm164_vm0, %v128_v40, %v1136_v49 }
 0x105   :  { %v243_v19 = vpop.permute.xlu2 %242 }
 0x106   :  { %v259_v20 = vsel %vm254_vm3, %v253_v17, %v243_v19  ;;  %v1119_v19 = vld [vmem:[%s1576_s10 + $0x18] sm:$0xff] }
 0x107   :  { %v1139_v51 = vpop.permute.xlu0 %1138  ;;  %v262_v21 = vpack.c.bf16 %v259_v20, %v259_v20  ;;  %v1118_v20 = vld [vmem:[%s1576_s10 + $0x10] sm:$0xff] }
 0x108   :  { %v1141_v52 = vunpack.i.h.bf16 %v1139_v51  ;;  %v1140_v53 = vunpack.i.l.bf16 %v1139_v51 }
 0x10a   :  { %v255_v57 = vsel %vm254_vm3, %v249_v55, %v1140_v53  ;;  %v256_v58 = vsel %vm254_vm3, %v250_v56, %v1141_v52 }
 0x10b   :  { %v260_v59 = vpack.c.bf16 %v256_v58, %v255_v57 }
 0x10d   :  { %987 = vmatmul.msk.bf16.vlgmr.msra.gmra.mxu2 %vm284_vm4, %v260_v59  ;;  %v1203_v59 = vld [vmem:[%s1575_s7] ss:$0 sm:$0xff]  ;;  %s1210_s7 = smov 40  }
 0x10f   :  { %v1144_v61 = vpop.permute.xlu1 %1143  ;;  %v1154_v22 = vpop.permute.xlu0 %1153 }
 0x110   :  { %v1146_v0 = vunpack.i.h.bf16 %v1144_v61  ;;  %v1145_v2 = vunpack.i.l.bf16 %v1144_v61  ;;  %v1156_v23 = vunpack.i.h.bf16 %v1154_v22  ;;  %v1155_v24 = vunpack.i.l.bf16 %v1154_v22 }
 0x112   :  { %v251_v6 = vsel %vm164_vm0, %v131_v43, %v1145_v2  ;;  %v252_v7 = vsel %vm164_vm0, %v133_v45, %v1146_v0  ;;  %v332_v25 = vsel %vm164_vm0, %v138_v48, %v1155_v24  ;;  %v333_v26 = vsel %vm164_vm0, %v141_v54, %v1156_v23  ;;  %v1117_v23 = vld [vmem:[%s1576_s10 + $0x8] sm:$0xff]  ;;  %v1116_v24 = vld [vmem:[%s1576_s10] sm:$0xff] }
 0x113   :  { %v334_v27 = vpack.c.bf16 %v333_v26, %v332_v25 }
 0x117   :  { %v1149_v3 = vpop.permute.xlu1 %1148 }
 0x118   :  { %v1151_v4 = vunpack.i.h.bf16 %v1149_v3  ;;  %v1150_v5 = vunpack.i.l.bf16 %v1149_v3 }
 0x11a   :  { %v257_v10 = vsel %vm254_vm3, %v251_v6, %v1150_v5  ;;  %v258_v11 = vsel %vm254_vm3, %v252_v7, %v1151_v4 }
 0x11b   :  { %v261_v16 = vpack.c.bf16 %v258_v11, %v257_v10 }
 0x11d   :  { %988 = vmatmul.msk.bf16.gmra.mxu2 %vm284_vm4, %v261_v16  ;;  %v1120_v16 = vld [vmem:[%s1576_s10 + $0x20] sm:$0xff] }
 0x11e   :  { %678 = vmatpush.bf16.msrb.mxu0 %v1120_v16 }
 0x122   :  { %679 = vmatpush.bf16.msrb.mxu0 %v1119_v19 }
 0x126   :  { %680 = vmatpush.bf16.msrb.mxu0 %v1118_v20 }
 0x12a   :  { %681 = vmatpush.bf16.msrb.mxu0 %v1117_v23 }
 0x12d   :  { %989 = vmatmul.msk.bf16.gmra.mxu2 %vm284_vm4, %v262_v21 }
 0x12e   :  { %682 = vmatpush.bf16.msrb.mxu0 %v1116_v24 }
 0x13d   :  { %998 = vmatmul.msk.bf16.vlgmr.msrb.gmra.mxu2 %vm254_vm3, %v334_v27 }
 0x190   :  { %v303_v29 = vpop.f32.mrf.mxu2 }
 0x191   :  { %v304_v30 = vadd.f32 %v1202_v28, %v303_v29  ;;  %v470_v29 = vld [vmem:[%s1577_s8 + $0x38] sm:$0xf] }
 0x193   :  { %v367_v31 = vmax.f32 %v304_v30, 0.0 }
 0x195   :  { %v372_v34 = vpack.c.bf16 %v367_v31, %v367_v31 }
 0x197   :  { %v386_v61 = vunpack.c.l.b16 %v372_v34  ;;  %v1115_v34 = vld [vmem:[%s1577_s8 + $0x30] sm:$0xff] }
 0x198   :  { %v305_v32 = vpop.f32.mrf.mxu2 }
 0x199   :  { %v306_v33 = vadd.f32 %v1202_v28, %v305_v32 }
 0x19b   :  { %v368_v35 = vmax.f32 %v306_v33, 0.0 }
 0x19d   :  { %v373_v36 = vpack.c.bf16 %v368_v35, %v368_v35  ;;  %v1162_v38 = vpack.i.bf16 %v368_v35, %v367_v31  ;;  %v563_v31 = vunpack.c.l.b16 %v470_v29 }
 0x19f   :  { %1163 = vrot.lane.b32.xlu2 %v1162_v38, %s1209_s1  ;;  %v387_v58 = vunpack.c.l.b16 %v373_v36  ;;  %v571_v32 = vpack.c.b16 %v563_v31, %v563_v31  ;;  %v1114_v38 = vld [vmem:[%s1577_s8 + $0x28] sm:$0xff] }
 0x1a0   :  { %v308_v37 = vpop.f32.mrf.mxu2 }
 0x1a1   :  { %v309_v39 = vadd.f32 %v1202_v28, %v308_v37  ;;  %v391_v62 = vpack.c.b16 %v387_v58, %v386_v61  ;;  %v590_v33 = vsel %vm113_vm1, %v571_v32, 0 }
 0x1a2   :  { %592 = vmatpush.bf16.msra.mxu2 %v590_v33 }
 0x1a3   :  { %v369_v40 = vmax.f32 %v309_v39, 0.0  ;;  %v1113_v39 = vld [vmem:[%s1577_s8 + $0x20] sm:$0xff] }
 0x1a5   :  { %v374_v43 = vpack.c.bf16 %v369_v40, %v369_v40 }
 0x1a6   :  { %593 = vmatpush.bf16.msra.mxu2 %v1115_v34  ;;  %v1205_v34 = vld [vmem:[%s1579_s9] ss:$0 sm:$0xff] }
 0x1a7   :  { %v388_v56 = vunpack.c.l.b16 %v374_v43  ;;  %v1112_v43 = vld [vmem:[%s1577_s8 + $0x18] sm:$0xff] }
 0x1a8   :  { %v310_v41 = vpop.f32.mrf.mxu2 }
 0x1a9   :  { %v311_v42 = vadd.f32 %v1202_v28, %v310_v41 }
 0x1aa   :  { %594 = vmatpush.bf16.msra.mxu2 %v1114_v38 }
 0x1ab   :  { %v370_v44 = vmax.f32 %v311_v42, 0.0 }
 0x1ad   :  { %v375_v45 = vpack.c.bf16 %v370_v44, %v370_v44  ;;  %v1177_v48 = vpack.i.bf16 %v370_v44, %v369_v40 }
 0x1ae   :  { %595 = vmatpush.bf16.msra.mxu2 %v1113_v39 }
 0x1af   :  { %1178 = vrot.lane.b32.xlu2 %v1177_v48, %s1209_s1  ;;  %v389_v54 = vunpack.c.l.b16 %v375_v45  ;;  %v1111_v45 = vld [vmem:[%s1577_s8 + $0x10] sm:$0xff] }
 0x1b0   :  { %v313_v46 = vpop.f32.mrf.mxu2 }
 0x1b1   :  { %v314_v47 = vadd.f32 %v1202_v28, %v313_v46  ;;  %v392_v57 = vpack.c.b16 %v389_v54, %v388_v56 }
 0x1b2   :  { %596 = vmatpush.bf16.msra.mxu2 %v1112_v43 }
 0x1b3   :  { %v371_v49 = vmax.f32 %v314_v47, 0.0 }
 0x1b5   :  { %v1393_v50 = vpack.c.bf16 %v371_v49, %v371_v49 }
 0x1b6   :  { %597 = vmatpush.bf16.msra.mxu2 %v1111_v45 }
 0x1b7   :  { %v390_v51 = vunpack.c.l.b16 %v1393_v50  ;;  %v476_v42 = vunpack.c.l.bf16 %v1393_v50 }
 0x1b8   :  { %v315_v52 = vpop.f32.mrf.mxu2 }
 0x1b9   :  { %v393_v53 = vpack.c.b16 %v390_v51, %v390_v51 }
 0x1bb   :  { %v397_v55 = vsel %vm113_vm1, %v393_v53, 0  ;;  %v1110_v53 = vld [vmem:[%s1577_s8 + $0x8] sm:$0xff] }
 0x1bc   :  { %404 = vmatpush.bf16.msra.mxu3 %v397_v55  ;;  %598 = vmatpush.bf16.msra.mxu2 %v1110_v53  ;;  %v1109_v55 = vld [vmem:[%s1577_s8] sm:$0xff] }
 0x1c0   :  { %v362_v60 = vpop.f32.mrf.mxu2  ;;  %405 = vmatpush.bf16.msra.mxu3 %v392_v57  ;;  %599 = vmatpush.bf16.msra.mxu2 %v1109_v55 }
 0x1c1   :  { %v363_v63 = vadd.f32 %v1203_v59, %v362_v60 }
 0x1c3   :  { %v377_v0 = vmax.f32 %v363_v63, 0.0 }
 0x1c4   :  { %406 = vmatpush.bf16.msra.mxu3 %v391_v62 }
 0x1c5   :  { %v379_v4 = vpack.c.bf16 %v377_v0, %v377_v0 }
 0x1c7   :  { %999 = vmatmul.msk.bf16.vlgmr.msra.gmra.mxu3 %vm100_vm2, %v1314_v9  ;;  %v429_v7 = vunpack.c.l.b16 %v379_v4 }
 0x1c8   :  { %v364_v2 = vpop.f32.mrf.mxu2 }
 0x1c9   :  { %v365_v3 = vadd.f32 %v1203_v59, %v364_v2 }
 0x1cb   :  { %v378_v5 = vmax.f32 %v365_v3, 0.0 }
 0x1cd   :  { %v380_v6 = vpack.c.bf16 %v378_v5, %v378_v5  ;;  %v1167_v11 = vpack.i.bf16 %v378_v5, %v377_v0 }
 0x1cf   :  { %v430_v10 = vunpack.c.l.b16 %v380_v6  ;;  %1168 = vrot.lane.b32.xlu0 %v1167_v11, %s1210_s7 }
 0x1d1   :  { %v431_v15 = vpack.c.b16 %v430_v10, %v429_v7 }
 0x1d3   :  { %440 = vmatpush.bf16.msrb.mxu1 %v431_v15 }
 0x1d6   :  { %1003 = vmatmul.msk.bf16.vlgmr.msrb.gmra.mxu1 %vm164_vm0, %v1292_v1 }
 0x1d7   :  { %1000 = vmatmul.msk.bf16.gmra.mxu3 %vm100_vm2, %v1330_v13 }
 0x1e6   :  { %1004 = vmatmul.msk.bf16.gmra.mxu1 %vm164_vm0, %v1309_v8 }
 0x1e7   :  { %1001 = vmatmul.msk.bf16.gmra.mxu3 %vm100_vm2, %v1337_v14 }
 0x1f6   :  { %1005 = vmatmul.msk.bf16.gmra.mxu1 %vm164_vm0, %v1323_v12 }
 0x1f7   :  { %1002 = vmatmul.msk.bf16.gmra.mxu3 %vm100_vm2, %v1344_v18 }
 0x1f9   :  { %v1164_v56 = vpop.permute.xlu2 %1163 }
 0x1fa   :  { %v1166_v60 = vunpack.i.h.bf16 %v1164_v56  ;;  %v1165_v61 = vunpack.i.l.bf16 %v1164_v56 }
 0x209   :  { %v1179_v4 = vpop.permute.xlu2 %1178 }
 0x20a   :  { %v1181_v10 = vunpack.i.h.bf16 %v1179_v4  ;;  %v1180_v11 = vunpack.i.l.bf16 %v1179_v4 }
 0x241   :  { %v1169_v44 = vpop.permute.xlu0 %1168 }
 0x242   :  { %v1171_v46 = vunpack.i.h.bf16 %v1169_v44  ;;  %v1170_v47 = vunpack.i.l.bf16 %v1169_v44 }
 0x24a   :  { %v1418_v17 = vpop.f32.mrf.mxu3 }
 0x252   :  { %v410_v21 = vpop.f32.mrf.mxu3 }
 0x253   :  { %v442_v22 = vpop.f32.mrf.mxu1 }
 0x25a   :  { %v1432_v25 = vpop.f32.mrf.mxu3 }
 0x25b   :  { %v444_v26 = vpop.f32.mrf.mxu1 }
 0x25c   :  { %v1157_v27 = vpack.i.bf16 %v444_v26, %v442_v22 }
 0x25e   :  { %1158 = vrot.lane.b32.xlu1 %v1157_v27, %s1210_s7 }
 0x262   :  { %v1435_v28 = vpop.f32.mrf.mxu3 }
 0x263   :  { %v447_v30 = vpop.f32.mrf.mxu1 }
 0x26a   :  { %v418_v35 = vpop.f32.mrf.mxu3 }
 0x26b   :  { %v449_v36 = vpop.f32.mrf.mxu1 }
 0x26c   :  { %v1172_v37 = vpack.i.bf16 %v449_v36, %v447_v30 }
 0x26e   :  { %1173 = vrot.lane.b32.xlu1 %v1172_v37, %s1210_s7 }
 0x272   :  { %v420_v40 = vpop.f32.mrf.mxu3 }
 0x273   :  { %v452_v41 = vpop.f32.mrf.mxu1  ;;  %v636_v49 = vsel %vm100_vm2, %v420_v40, %v1170_v47 }
 0x274   :  { %490 = vrot.lane.b32.xlu0 %v452_v41, %s1210_s7 }
 0x276   :  { %510 = vrot.lane.b32.xlu1 %v476_v42, %s1209_s1 }
 0x27a   :  { %v423_v48 = vpop.f32.mrf.mxu3 }
 0x27b   :  { %v637_v50 = vsel %vm100_vm2, %v423_v48, %v1171_v46  ;;  %v454_v51 = vpop.f32.mrf.mxu1 }
 0x27c   :  { %v638_v52 = vpack.c.bf16 %v637_v50, %v636_v49 }
 0x27e   :  { %1057 = vmatmul.msk.bf16.vlgmr.msrb.gmra.mxu0 %vm522_vm5, %v638_v52 }
 0x282   :  { %v425_v54 = vpop.f32.mrf.mxu3 }
 0x2d0   :  { %v1159_v57 = vpop.permute.xlu1 %1158 }
 0x2d1   :  { %v1161_v58 = vunpack.i.h.bf16 %v1159_v57  ;;  %v1160_v59 = vunpack.i.l.bf16 %v1159_v57 }
 0x2d3   :  { %v518_v62 = vsel %vm100_vm2, %v410_v21, %v1161_v58  ;;  %v517_v63 = vsel %vm100_vm2, %v1418_v17, %v1160_v59 }
 0x2d4   :  { %v524_v0 = vsel %vm522_vm5, %v518_v62, %v1166_v60  ;;  %v523_v2 = vsel %vm522_vm5, %v517_v63, %v1165_v61 }
 0x2d5   :  { %v528_v3 = vpack.c.bf16 %v524_v0, %v523_v2 }
 0x2d7   :  { %1034 = vmatmul.msk.bf16.vlgmr.msra.gmra.mxu2 %vm579_vm6, %v528_v3 }
 0x2e0   :  { %v1174_v5 = vpop.permute.xlu1 %1173 }
 0x2e1   :  { %v1176_v6 = vunpack.i.h.bf16 %v1174_v5  ;;  %v1175_v7 = vunpack.i.l.bf16 %v1174_v5 }
 0x2e3   :  { %v520_v15 = vsel %vm100_vm2, %v1435_v28, %v1176_v6  ;;  %v519_v16 = vsel %vm100_vm2, %v1432_v25, %v1175_v7  ;;  %v1204_v25 = vld [vmem:[%s1578_s11] ss:$0 sm:$0xff] }
 0x2e4   :  { %v525_v17 = vsel %vm522_vm5, %v519_v16, %v1180_v11  ;;  %v526_v19 = vsel %vm522_vm5, %v520_v15, %v1181_v10 }
 0x2e5   :  { %v529_v20 = vpack.c.bf16 %v526_v19, %v525_v17  ;;  %v1127_v17 = vld [vmem:[%s1581_s12 + $0x30] sm:$0xff]  ;;  %v1124_v19 = vld [vmem:[%s1581_s12 + $0x18] sm:$0xff] }
 0x2e6   :  { %v491_v21 = vpop.permute.xlu0 %490 }
 0x2e7   :  { %1035 = vmatmul.msk.bf16.gmra.mxu2 %vm579_vm6, %v529_v20  ;;  %v521_v22 = vsel %vm100_vm2, %v418_v35, %v491_v21  ;;  %v1123_v20 = vld [vmem:[%s1581_s12 + $0x10] sm:$0xff]  ;;  %v1122_v21 = vld [vmem:[%s1581_s12 + $0x8] sm:$0xff] }
 0x2e8   :  { %v511_v23 = vpop.permute.xlu1 %510 }
 0x2e9   :  { %v527_v24 = vsel %vm522_vm5, %v521_v22, %v511_v23  ;;  %v1121_v22 = vld [vmem:[%s1581_s12] sm:$0xff] }
 0x2ea   :  { %v530_v26 = vpack.c.bf16 %v527_v24, %v527_v24 }
 0x2f7   :  { %1036 = vmatmul.msk.bf16.gmra.mxu2 %vm579_vm6, %v530_v26 }
 0x2fb   :  { %v684_v27 = vpop.f32.mrf.mxu0 }
 0x2fc   :  { %v685_v28 = vadd.f32 %v1204_v25, %v684_v27 }
 0x2fe   :  { %v699_v31 = vmax.f32 %v685_v28, 0.0 }
 0x303   :  { %v686_v29 = vpop.f32.mrf.mxu0 }
 0x304   :  { %v687_v30 = vadd.f32 %v1204_v25, %v686_v29 }
 0x306   :  { %v700_v32 = vmax.f32 %v687_v30, 0.0 }
 0x308   :  { %v701_v33 = vpack.c.bf16 %v700_v32, %v699_v31 }
 0x30a   :  { %753 = vmatpush.bf16.msra.mxu0 %v701_v33 }
 0x30d   :  { %1062 = vmatmul.msk.bf16.vlgmr.msra.gmra.mxu0 %vm164_vm0, %v1292_v1 }
 0x31d   :  { %1063 = vmatmul.msk.bf16.gmra.mxu0 %vm164_vm0, %v1309_v8 }
 0x32d   :  { %1064 = vmatmul.msk.bf16.gmra.mxu0 %vm164_vm0, %v1323_v12 }
 0x35a   :  { %v601_v35 = vpop.f32.mrf.mxu2 }
 0x35b   :  { %v602_v36 = vadd.f32 %v1205_v34, %v601_v35 }
 0x35d   :  { %v689_v37 = vmax.f32 %v602_v36, 0.0 }
 0x35f   :  { %v694_v40 = vpack.c.bf16 %v689_v37, %v689_v37 }
 0x361   :  { %v707_v62 = vunpack.c.l.b16 %v694_v40 }
 0x362   :  { %v603_v38 = vpop.f32.mrf.mxu2 }
 0x363   :  { %v604_v39 = vadd.f32 %v1205_v34, %v603_v38 }
 0x365   :  { %v690_v41 = vmax.f32 %v604_v39, 0.0 }
 0x367   :  { %v695_v42 = vpack.c.bf16 %v690_v41, %v690_v41  ;;  %v1187_v1 = vpack.i.bf16 %v690_v41, %v689_v37 }
 0x369   :  { %1188 = vrot.lane.b32.xlu0 %v1187_v1, %s1209_s1  ;;  %v708_v60 = vunpack.c.l.b16 %v695_v42 }
 0x36a   :  { %v606_v43 = vpop.f32.mrf.mxu2 }
 0x36b   :  { %v607_v45 = vadd.f32 %v1205_v34, %v606_v43  ;;  %v712_v63 = vpack.c.b16 %v708_v60, %v707_v62 }
 0x36d   :  { %v691_v49 = vmax.f32 %v607_v45, 0.0 }
 0x36f   :  { %v696_v53 = vpack.c.bf16 %v691_v49, %v691_v49 }
 0x371   :  { %v709_v58 = vunpack.c.l.b16 %v696_v53 }
 0x372   :  { %v608_v8 = vpop.f32.mrf.mxu2 }
 0x373   :  { %v609_v44 = vadd.f32 %v1205_v34, %v608_v8 }
 0x375   :  { %v692_v47 = vmax.f32 %v609_v44, 0.0 }
 0x377   :  { %v697_v51 = vpack.c.bf16 %v692_v47, %v692_v47  ;;  %v1197_v4 = vpack.i.bf16 %v692_v47, %v691_v49 }
 0x379   :  { %v710_v56 = vunpack.c.l.b16 %v697_v51 }
 0x37a   :  { %v611_v12 = vpop.f32.mrf.mxu2 }
 0x37b   :  { %v612_v46 = vadd.f32 %v1205_v34, %v611_v12  ;;  %v713_v59 = vpack.c.b16 %v710_v56, %v709_v58 }
 0x37d   :  { %v693_v48 = vmax.f32 %v612_v46, 0.0 }
 0x37f   :  { %v698_v50 = vpack.c.bf16 %v693_v48, %v693_v48 }
 0x381   :  { %v711_v52 = vunpack.c.l.b16 %v698_v50  ;;  %v789_v10 = vunpack.c.l.bf16 %v698_v50 }
 0x382   :  { %v613_v54 = vpop.f32.mrf.mxu2 }
 0x383   :  { %v714_v55 = vpack.c.b16 %v711_v52, %v711_v52 }
 0x385   :  { %v718_v57 = vsel %vm113_vm1, %v714_v55, 0  ;;  %v1206_v55 = vld [vmem:[%s1580_s13] ss:$0 sm:$0xff] }
 0x386   :  { %725 = vmatpush.bf16.msrb.mxu3 %v718_v57 }
 0x38a   :  { %726 = vmatpush.bf16.msrb.mxu3 %v713_v59  ;;  %v755_v61 = vpop.f32.mrf.mxu0 }
 0x38e   :  { %727 = vmatpush.bf16.msrb.mxu3 %v712_v63 }
 0x391   :  { %1058 = vmatmul.msk.bf16.vlgmr.msrb.gmra.mxu3 %vm100_vm2, %v1314_v9 }
 0x392   :  { %v757_v0 = vpop.f32.mrf.mxu0 }
 0x393   :  { %v1182_v2 = vpack.i.bf16 %v757_v0, %v755_v61 }
 0x395   :  { %1183 = vrot.lane.b32.xlu2 %v1182_v2, %s1210_s7 }
 0x39a   :  { %v760_v3 = vpop.f32.mrf.mxu0 }
 0x39d   :  { %1198 = vrot.lane.b32.xlu2 %v1197_v4, %s1209_s1 }
 0x3a1   :  { %1059 = vmatmul.msk.bf16.gmra.mxu3 %vm100_vm2, %v1330_v13  ;;  %v783_v13 = vld [vmem:[%s1581_s12 + $0x38] sm:$0xf] }
 0x3a2   :  { %v762_v5 = vpop.f32.mrf.mxu0  ;;  %v875_v11 = vunpack.c.l.b16 %v783_v13 }
 0x3a3   :  { %v1192_v6 = vpack.i.bf16 %v762_v5, %v760_v3 }
 0x3a4   :  { %v883_v15 = vpack.c.b16 %v875_v11, %v875_v11 }
 0x3a5   :  { %1193 = vrot.lane.b32.xlu1 %v1192_v6, %s1210_s7 }
 0x3a6   :  { %v901_v16 = vsel %vm113_vm1, %v883_v15, 0 }
 0x3a7   :  { %903 = vmatpush.bf16.msra.mxu1 %v901_v16 }
 0x3aa   :  { %v765_v7 = vpop.f32.mrf.mxu0 }
 0x3ab   :  { %803 = vrot.lane.b32.xlu0 %v765_v7, %s1210_s7  ;;  %904 = vmatpush.bf16.msra.mxu1 %v1127_v17 }
 0x3ad   :  { %823 = vrot.lane.b32.xlu1 %v789_v10, %s1209_s1 }
 0x3b1   :  { %1060 = vmatmul.msk.bf16.gmra.mxu3 %vm100_vm2, %v1337_v14  ;;  %v1126_v14 = vld [vmem:[%s1581_s12 + $0x28] sm:$0xff] }
 0x3b2   :  { %v767_v9 = vpop.f32.mrf.mxu0  ;;  %905 = vmatpush.bf16.msra.mxu1 %v1126_v14 }
 0x3c1   :  { %1061 = vmatmul.msk.bf16.gmra.mxu3 %vm100_vm2, %v1344_v18  ;;  %v1125_v18 = vld [vmem:[%s1581_s12 + $0x20] sm:$0xff] }
 0x3c2   :  { %906 = vmatpush.bf16.msra.mxu1 %v1125_v18 }
 0x3c6   :  { %907 = vmatpush.bf16.msra.mxu1 %v1124_v19 }
 0x3ca   :  { %908 = vmatpush.bf16.msra.mxu1 %v1123_v20 }
 0x3ce   :  { %909 = vmatpush.bf16.msra.mxu1 %v1122_v21 }
 0x3d2   :  { %910 = vmatpush.bf16.msra.mxu1 %v1121_v22 }
 0x3db   :  { %v1189_v26 = vpop.permute.xlu0 %1188 }
 0x3dc   :  { %v1191_v29 = vunpack.i.h.bf16 %v1189_v26  ;;  %v1190_v30 = vunpack.i.l.bf16 %v1189_v26 }
 0x3ef   :  { %v1184_v24 = vpop.permute.xlu2 %1183 }
 0x3f0   :  { %v1185_v27 = vunpack.i.l.bf16 %v1184_v24  ;;  %v1186_v25 = vunpack.i.h.bf16 %v1184_v24 }
 0x3f7   :  { %v1199_v39 = vpop.permute.xlu2 %1198 }
 0x3f8   :  { %v1201_v42 = vunpack.i.h.bf16 %v1199_v39  ;;  %v1200_v43 = vunpack.i.l.bf16 %v1199_v39 }
 0x414   :  { %v729_v23 = vpop.f32.mrf.mxu3 }
 0x415   :  { %v830_v28 = vsel %vm100_vm2, %v729_v23, %v1185_v27 }
 0x416   :  { %v835_v33 = vsel %vm522_vm5, %v830_v28, %v1190_v30 }
 0x417   :  { %v1194_v37 = vpop.permute.xlu1 %1193 }
 0x418   :  { %v1195_v38 = vunpack.i.l.bf16 %v1194_v37  ;;  %v1196_v40 = vunpack.i.h.bf16 %v1194_v37 }
 0x41c   :  { %v731_v31 = vpop.f32.mrf.mxu3 }
 0x41d   :  { %v831_v32 = vsel %vm100_vm2, %v731_v31, %v1186_v25  ;;  %v804_v47 = vpop.permute.xlu0 %803 }
 0x41e   :  { %v836_v34 = vsel %vm522_vm5, %v831_v32, %v1191_v29 }
 0x41f   :  { %v840_v35 = vpack.c.bf16 %v836_v34, %v835_v33  ;;  %v824_v49 = vpop.permute.xlu1 %823 }
 0x421   :  { %1093 = vmatmul.msk.bf16.vlgmr.msra.gmra.mxu1 %vm579_vm6, %v840_v35 }
 0x424   :  { %v734_v36 = vpop.f32.mrf.mxu3 }
 0x425   :  { %v832_v41 = vsel %vm100_vm2, %v734_v36, %v1195_v38 }
 0x426   :  { %v837_v44 = vsel %vm522_vm5, %v832_v41, %v1200_v43 }
 0x42c   :  { %v736_v1 = vpop.f32.mrf.mxu3 }
 0x42d   :  { %v833_v8 = vsel %vm100_vm2, %v736_v1, %v1196_v40 }
 0x42e   :  { %v838_v45 = vsel %vm522_vm5, %v833_v8, %v1201_v42 }
 0x42f   :  { %v841_v12 = vpack.c.bf16 %v838_v45, %v837_v44 }
 0x431   :  { %1094 = vmatmul.msk.bf16.gmra.mxu1 %vm579_vm6, %v841_v12 }
 0x434   :  { %v739_v46 = vpop.f32.mrf.mxu3 }
 0x435   :  { %v834_v48 = vsel %vm100_vm2, %v739_v46, %v804_v47 }
 0x436   :  { %v839_v50 = vsel %vm522_vm5, %v834_v48, %v824_v49 }
 0x437   :  { %v842_v52 = vpack.c.bf16 %v839_v50, %v839_v50 }
 0x43c   :  { %v741_v51 = vpop.f32.mrf.mxu3 }
 0x441   :  { %1095 = vmatmul.msk.bf16.gmra.mxu1 %vm579_vm6, %v842_v52 }
 0x444   :  { %v743_v53 = vpop.f32.mrf.mxu3 }
 0x44c   :  { %v744_v54 = vpop.f32.mrf.mxu3 }
 0x49e   :  { %v912_v56 = vpop.f32.mrf.mxu1 }
 0x49f   :  { %v913_v57 = vadd.f32 %v1206_v55, %v912_v56 }
 0x4a1   :  { %927 = vst.msk [vmem:[%s1582_s14] sm:$0xff] %vm926_vm7, %v913_v57 }
 0x4a6   :  { %v914_v58 = vpop.f32.mrf.mxu1 }
 0x4a7   :  { %v915_v59 = vadd.f32 %v1206_v55, %v914_v58 }
 0x4a9   :  { %928 = vst.msk [vmem:[%s1582_s14 + $0x8] sm:$0xff] %vm926_vm7, %v915_v59 }
 0x4ae   :  { %v917_v60 = vpop.f32.mrf.mxu1 }
 0x4af   :  { %v918_v61 = vadd.f32 %v1206_v55, %v917_v60 }
 0x4b1   :  { %929 = vst.msk [vmem:[%s1582_s14 + $0x10] sm:$0xff] %vm926_vm7, %v918_v61 }
 0x4b6   :  { %v919_v62 = vpop.f32.mrf.mxu1 }
 0x4b7   :  { %v920_v63 = vadd.f32 %v1206_v55, %v919_v62 }
 0x4b9   :  { %930 = vst.msk [vmem:[%s1582_s14 + $0x18] sm:$0xff] %vm926_vm7, %v920_v63 }
 0x4be   :  { %v922_v0 = vpop.f32.mrf.mxu1 }
 0x4bf   :  { %v923_v2 = vadd.f32 %v1206_v55, %v922_v0 }
 0x4c1   :  { %931 = vst.msk [vmem:[%s1582_s14 + $0x20] sm:$0xff] %vm926_vm7, %v923_v2 }
 0x4c6   :  { %v924_v3 = vpop.f32.mrf.mxu1 }

</bundles_post_ra>
